<compile_context>
chip_gen: v6e
topology: v6e:2x2x1
jax: 0.10.0
libtpu: 0.0.40
codegen_flags: <defaults>
</compile_context>

<pallas_src>
import functools

import jax
import jax.numpy as jnp
from jax import lax
from jax.experimental import pallas as pl
from jax.experimental.pallas import tpu as pltpu


def _round_up(x, m):
    return (x + m - 1) // m * m


def _vmem_capacity_bytes():
    try:
        cap = int(pltpu.get_tpu_info().vmem_capacity_bytes)
        if cap > 0:
            return cap
    except Exception:
        pass
    return 128 << 20  # v5e/v6e default


def _choose_tiles(n, c, hw, itemsize, target_block_bytes, limit_cap, cr):
    """Pick (Nb, THW). Nb is either n (block == full batch dim) or a multiple of
    8 (so a partial last batch block keeps the (8,128)-aligned out spec); THW is
    a multiple of 128. Shrink until double-buffered input + per-lane
    accumulators + weights fit under limit_cap."""
    hw_pad = _round_up(hw, 128)
    plane_bytes = c * hw_pad * itemsize
    rows_fit = int(target_block_bytes // max(plane_bytes, 1))
    if rows_fit >= n:                          # whole batch in one block
        nb, thw = n, hw_pad
    elif rows_fit >= 8:                        # several full planes per block
        nb, thw = (rows_fit // 8) * 8, hw_pad
    else:                                      # one plane is big: tile HW
        nb = n if n < 8 else 8
        lanes = (target_block_bytes // max(nb * c * itemsize, 1)) // 128 * 128
        thw = int(min(hw_pad, max(128, lanes)))
    fixed = 2 * (c * cr + cr * c) * 4 + (4 << 20)   # weights (2x buffered) + margin
    while True:
        block = nb * c * thw * itemsize
        scratch = 2 * nb * c * 128 * 4
        if 2 * block + scratch + fixed <= limit_cap:
            break
        if thw > 128:
            thw = max(128, (thw // 2) // 128 * 128)
        elif nb > 8:
            nb = max(8, ((nb // 2) // 8) * 8)
        else:
            break
    return nb, thw


def _accumulate_tile(x_ref, sum_acc, max_acc, *, n_chunks, valid_lanes=None):
    """Add this tile's 128-lane partial sums / maxes into the scratch refs.

    valid_lanes: static int = number of valid local lanes in this tile (edge HW
    block only); None = fully valid tile (pure VPU add/max, no masking)."""

    def add_chunk(start):
        sl = x_ref[:, :, pl.ds(start, 128)].astype(jnp.float32)
        if valid_lanes is not None:
            lane = lax.broadcasted_iota(jnp.int32, sl.shape, dimension=2)
            ok = (start + lane) < valid_lanes
            s_chunk = jnp.where(ok, sl, 0.0)
            m_chunk = jnp.where(ok, sl, -jnp.inf)
        else:
            s_chunk = m_chunk = sl
        sum_acc[...] += s_chunk
        max_acc[...] = jnp.maximum(max_acc[...], m_chunk)

    if n_chunks <= 16:                         # short: unroll for LLO visibility
        for j in range(n_chunks):
            add_chunk(j * 128)
    else:
        def body(j, carry):
            add_chunk(pl.multiple_of(j * 128, 128))
            return carry
        lax.fori_loop(0, n_chunks, body, 0)


def _channel_attention_kernel(x_ref, w1t_ref, w2t_ref, o_ref, sum_acc, max_acc,
                              *, hw, n_chunks, needs_mask, valid_lanes_last):
    # x_ref:   (Nb, C, THW)  input tile for this (batch-block, HW-block)
    # w1t_ref: (C, Cr)       fc1 weight transposed (Conv2d (Cr,C,1,1) squeezed)
    # w2t_ref: (Cr, C)       fc2 weight transposed (Conv2d (C,Cr,1,1) squeezed)
    # o_ref:   (Nb, C)       sigmoid(fc2(relu(fc1(avg))) + fc2(relu(fc1(max))))
    # sum_acc/max_acc: (Nb, C, 128) f32 per-lane partial sum / running max
    k = pl.program_id(1)
    last_k = pl.num_programs(1) - 1

    @pl.when(k == 0)
    def _():
        sum_acc[...] = jnp.zeros_like(sum_acc)
        max_acc[...] = jnp.full_like(max_acc, -jnp.inf)

    if needs_mask:
        # Only the last HW block straddles the real spatial extent; interior
        # blocks keep the lean unmasked path.
        @pl.when(k != last_k)
        def _():
            _accumulate_tile(x_ref, sum_acc, max_acc, n_chunks=n_chunks)

        @pl.when(k == last_k)
        def _():
            _accumulate_tile(x_ref, sum_acc, max_acc, n_chunks=n_chunks,
                             valid_lanes=valid_lanes_last)
    else:
        _accumulate_tile(x_ref, sum_acc, max_acc, n_chunks=n_chunks)

    @pl.when(k == last_k)
    def _():
        # Single cross-lane reduce + relayout, once per batch block.
        avg = jnp.sum(sum_acc[...], axis=-1) * (1.0 / hw)        # (Nb, C)
        mx = jnp.max(max_acc[...], axis=-1)                      # (Nb, C)
        w1t = w1t_ref[...]
        w2t = w2t_ref[...]
        h_avg = jnp.maximum(
            jnp.dot(avg, w1t, preferred_element_type=jnp.float32), 0.0)
        h_max = jnp.maximum(
            jnp.dot(mx, w1t, preferred_element_type=jnp.float32), 0.0)
        logits = (jnp.dot(h_avg, w2t, preferred_element_type=jnp.float32)
                  + jnp.dot(h_max, w2t, preferred_element_type=jnp.float32))
        o_ref[...] = jax.nn.sigmoid(logits).astype(o_ref.dtype)


def channel_attention(x, w_fc1, w_fc2, *, target_block_bytes=None):
    """x: (N, C, H, W). w_fc1: (Cr, C), w_fc2: (C, Cr) (1x1 conv weights squeezed).
    Returns the (N, C, 1, 1) channel-attention map (PyTorch module output)."""
    n, c, h, w = x.shape
    cr = w_fc1.shape[0]
    hw = h * w
    itemsize = jnp.dtype(x.dtype).itemsize

    vmem_cap = _vmem_capacity_bytes()
    limit_cap = (vmem_cap * 3) // 4                 # ~96 MiB v5e/v6e, ~48 MiB v7x
    if target_block_bytes is None:
        target_block_bytes = (16 << 20) if vmem_cap >= (96 << 20) else (8 << 20)

    nb, thw = _choose_tiles(n, c, hw, itemsize, target_block_bytes, limit_cap, cr)
    n_hw_blocks = pl.cdiv(hw, thw)
    needs_mask = (n_hw_blocks * thw) != hw
    valid_lanes_last = hw - (n_hw_blocks - 1) * thw
    n_chunks = thw // 128

    kernel = functools.partial(
        _channel_attention_kernel, hw=hw, n_chunks=n_chunks,
        needs_mask=needs_mask, valid_lanes_last=valid_lanes_last)

    block_bytes = nb * c * thw * itemsize
    scratch_bytes = 2 * nb * c * 128 * 4
    weights_bytes = 2 * (c * cr + cr * c) * 4
    needed = 2 * block_bytes + scratch_bytes + weights_bytes + (2 << 20)
    vmem_limit = int(min(limit_cap, max(32 << 20, needed)))

    # TODO(synk): on v7x with a single batch block (N <= Nb) the second
    # TensorCore idles; a size-2 core axis over HW halves (partials combined in
    # the finalize) would feed it.
    out = pl.pallas_call(
        kernel,
        out_shape=jax.ShapeDtypeStruct((n, c), x.dtype),
        grid_spec=pltpu.PrefetchScalarGridSpec(
            num_scalar_prefetch=0,
            grid=(pl.cdiv(n, nb), n_hw_blocks),
            in_specs=[
                pl.BlockSpec((nb, c, thw), lambda b, k: (b, 0, k)),
                pl.BlockSpec((c, cr), lambda b, k: (0, 0)),
                pl.BlockSpec((cr, c), lambda b, k: (0, 0)),
            ],
            out_specs=pl.BlockSpec((nb, c), lambda b, k: (b, 0)),
            scratch_shapes=[
                pltpu.VMEM((nb, c, 128), jnp.float32),   # per-lane partial sums
                pltpu.VMEM((nb, c, 128), jnp.float32),   # per-lane running maxes
            ],
        ),
        compiler_params=pltpu.CompilerParams(
            dimension_semantics=("parallel", "arbitrary"),
            vmem_limit_bytes=vmem_limit,
        ),
    )(x.reshape(n, c, hw), w_fc1.T, w_fc2.T)

    return out.reshape(n, c, 1, 1)


def _reference(x, w_fc1, w_fc2):
    # Pure-JAX reference of the PyTorch forward.
    avg = jnp.mean(x, axis=(2, 3))                     # (N, C)
    mx = jnp.max(x, axis=(2, 3))                       # (N, C)

    def mlp(v):
        return jnp.maximum(v @ w_fc1.T, 0.0) @ w_fc2.T

    return jax.nn.sigmoid(mlp(avg) + mlp(mx))[:, :, None, None]


def _run_case(key, n, c, h, w, r, **kwargs):
    kx, k1, k2 = jax.random.split(key, 3)
    cr = max(1, c // r)
    x = jax.random.normal(kx, (n, c, h, w), dtype=jnp.float32)
    w_fc1 = jax.random.normal(k1, (cr, c), dtype=jnp.float32) * 0.1
    w_fc2 = jax.random.normal(k2, (c, cr), dtype=jnp.float32) * 0.1
    out = jax.block_until_ready(channel_attention(x, w_fc1, w_fc2, **kwargs))
    ref = _reference(x, w_fc1, w_fc2)
    assert out.shape == (n, c, 1, 1), out.shape
    err = float(jnp.max(jnp.abs(out - ref)))
    assert jnp.allclose(out, ref, atol=1e-5, rtol=1e-5), err


if __name__ == "__main__":
    key = jax.random.PRNGKey(0)
    keys = jax.random.split(key, 5)
    # Module-default small shape: in_channels=64, reduction_ratio=16.
    _run_case(keys[0], 2, 64, 16, 16, 16)
    # Multi HW-block accumulation path (forced small block budget).
    _run_case(keys[1], 4, 128, 32, 32, 8, target_block_bytes=256 << 10)
    # Non-128-multiple spatial extent (HW=100) -> gated lane-mask path.
    _run_case(keys[2], 3, 64, 10, 10, 16)
    # Partial last batch block without host-side padding (N=12, Nb=8) + HW tiling.
    _run_case(keys[3], 12, 128, 32, 32, 8, target_block_bytes=256 << 10)
    # >16 lane chunks -> fori_loop accumulation path.
    _run_case(keys[4], 2, 64, 48, 48, 16)
    print("KERNEL_OK")
</pallas_src>

<mosaic_0001>
module attributes {stable_mosaic.version = 11 : i64} {
  func.func @_channel_attention_kernel(%arg0: i32, %arg1: i32, %arg2: memref<2x64x256xf32, #tpu.memory_space<vmem>>, %arg3: memref<64x4xf32, #tpu.memory_space<vmem>>, %arg4: memref<4x64xf32, #tpu.memory_space<vmem>>, %arg5: memref<2x64xf32, #tpu.memory_space<vmem>>, %arg6: memref<2x64x128xf32, #tpu.memory_space<vmem>>, %arg7: memref<2x64x128xf32, #tpu.memory_space<vmem>>) attributes {dimension_semantics = [#tpu.dimension_semantics<parallel>, #tpu.dimension_semantics<arbitrary>], iteration_bounds = array<i64: 1, 1>, scalar_prefetch = 0 : i64, scratch_operands = 2 : i64, tpu.core_type = #tpu.core_type<tc>, window_params = [{transform_indices = @transform_0, window_bounds = array<i64: 2, 64, 256>}, {pipeline_mode = #tpu.pipeline_mode<synchronous>, transform_indices = @transform_1, window_bounds = array<i64: 64, 4>}, {pipeline_mode = #tpu.pipeline_mode<synchronous>, transform_indices = @transform_2, window_bounds = array<i64: 4, 64>}, {transform_indices = @transform_3, window_bounds = array<i64: 2, 64>}]} {
    %c0_i32 = arith.constant 0 : i32
    %0 = arith.cmpi eq, %arg1, %c0_i32 : i32
    %1 = arith.extui %0 : i1 to i32
    %c0_i32_0 = arith.constant 0 : i32
    %2 = arith.cmpi ne, %1, %c0_i32_0 : i32
    scf.if %2 {
      %cst = arith.constant 0.000000e+00 : f32
      %20 = vector.broadcast %cst : f32 to vector<2x64x128xf32>
      %c0_31 = arith.constant 0 : index
      %c0_32 = arith.constant 0 : index
      %c0_33 = arith.constant 0 : index
      %21 = vector.load %arg6[%c0_31, %c0_32, %c0_33] : memref<2x64x128xf32, #tpu.memory_space<vmem>>, vector<2x64x128xf32>
      tpu.vector_store %arg6[%c0_31, %c0_32, %c0_33], %20 {strides = array<i32>} : memref<2x64x128xf32, #tpu.memory_space<vmem>>, vector<2x64x128xf32>,
      %cst_34 = arith.constant 0xFF800000 : f32
      %22 = vector.broadcast %cst_34 : f32 to vector<2x64x128xf32>
      %c0_35 = arith.constant 0 : index
      %c0_36 = arith.constant 0 : index
      %c0_37 = arith.constant 0 : index
      %23 = vector.load %arg7[%c0_35, %c0_36, %c0_37] : memref<2x64x128xf32, #tpu.memory_space<vmem>>, vector<2x64x128xf32>
      tpu.vector_store %arg7[%c0_35, %c0_36, %c0_37], %22 {strides = array<i32>} : memref<2x64x128xf32, #tpu.memory_space<vmem>>, vector<2x64x128xf32>,
    } else {
    }
    %c0 = arith.constant 0 : index
    %c0_1 = arith.constant 0 : index
    %c0_2 = arith.constant 0 : index
    %3 = vector.load %arg2[%c0, %c0_1, %c0_2] : memref<2x64x256xf32, #tpu.memory_space<vmem>>, vector<2x64x128xf32>
    %c0_3 = arith.constant 0 : index
    %c0_4 = arith.constant 0 : index
    %c0_5 = arith.constant 0 : index
    %4 = vector.load %arg6[%c0_3, %c0_4, %c0_5] : memref<2x64x128xf32, #tpu.memory_space<vmem>>, vector<2x64x128xf32>
    %5 = arith.addf %4, %3 : vector<2x64x128xf32>
    %c0_6 = arith.constant 0 : index
    %c0_7 = arith.constant 0 : index
    %c0_8 = arith.constant 0 : index
    %6 = vector.load %arg6[%c0_6, %c0_7, %c0_8] : memref<2x64x128xf32, #tpu.memory_space<vmem>>, vector<2x64x128xf32>
    tpu.vector_store %arg6[%c0_6, %c0_7, %c0_8], %5 {strides = array<i32>} : memref<2x64x128xf32, #tpu.memory_space<vmem>>, vector<2x64x128xf32>,
    %c0_9 = arith.constant 0 : index
    %c0_10 = arith.constant 0 : index
    %c0_11 = arith.constant 0 : index
    %7 = vector.load %arg7[%c0_9, %c0_10, %c0_11] : memref<2x64x128xf32, #tpu.memory_space<vmem>>, vector<2x64x128xf32>
    %8 = arith.maximumf %7, %3 : vector<2x64x128xf32>
    %c0_12 = arith.constant 0 : index
    %c0_13 = arith.constant 0 : index
    %c0_14 = arith.constant 0 : index
    %9 = vector.load %arg7[%c0_12, %c0_13, %c0_14] : memref<2x64x128xf32, #tpu.memory_space<vmem>>, vector<2x64x128xf32>
    tpu.vector_store %arg7[%c0_12, %c0_13, %c0_14], %8 {strides = array<i32>} : memref<2x64x128xf32, #tpu.memory_space<vmem>>, vector<2x64x128xf32>,
    %c0_15 = arith.constant 0 : index
    %c0_16 = arith.constant 0 : index
    %c128 = arith.constant 128 : index
    %10 = vector.load %arg2[%c0_15, %c0_16, %c128] : memref<2x64x256xf32, #tpu.memory_space<vmem>>, vector<2x64x128xf32>
    %c0_17 = arith.constant 0 : index
    %c0_18 = arith.constant 0 : index
    %c0_19 = arith.constant 0 : index
    %11 = vector.load %arg6[%c0_17, %c0_18, %c0_19] : memref<2x64x128xf32, #tpu.memory_space<vmem>>, vector<2x64x128xf32>
    %12 = arith.addf %11, %10 : vector<2x64x128xf32>
    %c0_20 = arith.constant 0 : index
    %c0_21 = arith.constant 0 : index
    %c0_22 = arith.constant 0 : index
    %13 = vector.load %arg6[%c0_20, %c0_21, %c0_22] : memref<2x64x128xf32, #tpu.memory_space<vmem>>, vector<2x64x128xf32>
    tpu.vector_store %arg6[%c0_20, %c0_21, %c0_22], %12 {strides = array<i32>} : memref<2x64x128xf32, #tpu.memory_space<vmem>>, vector<2x64x128xf32>,
    %c0_23 = arith.constant 0 : index
    %c0_24 = arith.constant 0 : index
    %c0_25 = arith.constant 0 : index
    %14 = vector.load %arg7[%c0_23, %c0_24, %c0_25] : memref<2x64x128xf32, #tpu.memory_space<vmem>>, vector<2x64x128xf32>
    %15 = arith.maximumf %14, %10 : vector<2x64x128xf32>
    %c0_26 = arith.constant 0 : index
    %c0_27 = arith.constant 0 : index
    %c0_28 = arith.constant 0 : index
    %16 = vector.load %arg7[%c0_26, %c0_27, %c0_28] : memref<2x64x128xf32, #tpu.memory_space<vmem>>, vector<2x64x128xf32>
    tpu.vector_store %arg7[%c0_26, %c0_27, %c0_28], %15 {strides = array<i32>} : memref<2x64x128xf32, #tpu.memory_space<vmem>>, vector<2x64x128xf32>,
    %c0_i32_29 = arith.constant 0 : i32
    %17 = arith.cmpi eq, %arg1, %c0_i32_29 : i32
    %18 = arith.extui %17 : i1 to i32
    %c0_i32_30 = arith.constant 0 : i32
    %19 = arith.cmpi ne, %18, %c0_i32_30 : i32
    scf.if %19 {
      %c0_31 = arith.constant 0 : index
      %c0_32 = arith.constant 0 : index
      %c0_33 = arith.constant 0 : index
      %20 = vector.load %arg6[%c0_31, %c0_32, %c0_33] : memref<2x64x128xf32, #tpu.memory_space<vmem>>, vector<2x64x128xf32>
      %cst = arith.constant dense<0.000000e+00> : vector<2x64xf32>
      %21 = vector.multi_reduction <add>, %20, %cst [2] : vector<2x64x128xf32> to vector<2x64xf32>
      %cst_34 = arith.constant 3.906250e-03 : f32
      %22 = vector.broadcast %cst_34 : f32 to vector<2x64xf32>
      %23 = arith.mulf %21, %22 : vector<2x64xf32>
      %c0_35 = arith.constant 0 : index
      %c0_36 = arith.constant 0 : index
      %c0_37 = arith.constant 0 : index
      %24 = vector.load %arg7[%c0_35, %c0_36, %c0_37] : memref<2x64x128xf32, #tpu.memory_space<vmem>>, vector<2x64x128xf32>
      %cst_38 = arith.constant dense<0xFF800000> : vector<2x64xf32>
      %25 = vector.multi_reduction <maximumf>, %24, %cst_38 [2] : vector<2x64x128xf32> to vector<2x64xf32>
      %c0_39 = arith.constant 0 : index
      %c0_40 = arith.constant 0 : index
      %26 = vector.load %arg3[%c0_39, %c0_40] : memref<64x4xf32, #tpu.memory_space<vmem>>, vector<64x4xf32>
      %c0_41 = arith.constant 0 : index
      %c0_42 = arith.constant 0 : index
      %27 = vector.load %arg4[%c0_41, %c0_42] : memref<4x64xf32, #tpu.memory_space<vmem>>, vector<4x64xf32>
      %cst_43 = arith.constant dense<0.000000e+00> : vector<2x4xf32>
      %28 = tpu.matmul %23, %26, %cst_43 {dimension_numbers = #tpu.dot_dimension_numbers<[1], [0], [0], [1], [0, 0, 1, 1], [], []>} : vector<2x64xf32>, vector<64x4xf32>, vector<2x4xf32> -> vector<2x4xf32>
      %cst_44 = arith.constant 0.000000e+00 : f32
      %29 = vector.broadcast %cst_44 : f32 to vector<2x4xf32>
      %30 = arith.maximumf %28, %29 : vector<2x4xf32>
      %cst_45 = arith.constant dense<0.000000e+00> : vector<2x4xf32>
      %31 = tpu.matmul %25, %26, %cst_45 {dimension_numbers = #tpu.dot_dimension_numbers<[1], [0], [0], [1], [0, 0, 1, 1], [], []>} : vector<2x64xf32>, vector<64x4xf32>, vector<2x4xf32> -> vector<2x4xf32>
      %cst_46 = arith.constant 0.000000e+00 : f32
      %32 = vector.broadcast %cst_46 : f32 to vector<2x4xf32>
      %33 = arith.maximumf %31, %32 : vector<2x4xf32>
      %cst_47 = arith.constant dense<0.000000e+00> : vector<2x64xf32>
      %34 = tpu.matmul %30, %27, %cst_47 {dimension_numbers = #tpu.dot_dimension_numbers<[1], [0], [0], [1], [0, 0, 1, 1], [], []>} : vector<2x4xf32>, vector<4x64xf32>, vector<2x64xf32> -> vector<2x64xf32>
      %cst_48 = arith.constant dense<0.000000e+00> : vector<2x64xf32>
      %35 = tpu.matmul %33, %27, %cst_48 {dimension_numbers = #tpu.dot_dimension_numbers<[1], [0], [0], [1], [0, 0, 1, 1], [], []>} : vector<2x4xf32>, vector<4x64xf32>, vector<2x64xf32> -> vector<2x64xf32>
      %36 = arith.addf %34, %35 : vector<2x64xf32>
      %37 = arith.negf %36 : vector<2x64xf32>
      %38 = math.exp %37 : vector<2x64xf32>
      %cst_49 = arith.constant 1.000000e+00 : f32
      %39 = vector.broadcast %cst_49 : f32 to vector<2x64xf32>
      %40 = arith.addf %39, %38 : vector<2x64xf32>
      %41 = arith.divf %39, %40 : vector<2x64xf32>
      %c0_50 = arith.constant 0 : index
      %c0_51 = arith.constant 0 : index
      %42 = vector.load %arg5[%c0_50, %c0_51] : memref<2x64xf32, #tpu.memory_space<vmem>>, vector<2x64xf32>
      tpu.vector_store %arg5[%c0_50, %c0_51], %41 {strides = array<i32>} : memref<2x64xf32, #tpu.memory_space<vmem>>, vector<2x64xf32>,
    } else {
    }
    return
  }
  func.func @transform_0(%arg0: i32, %arg1: i32) -> (i32, i32, i32) {
    %c0_i32 = arith.constant 0 : i32
    %c0_i32_0 = arith.constant 0 : i32
    return %arg0, %c0_i32, %arg1 : i32, i32, i32
  }
  func.func @transform_1(%arg0: i32, %arg1: i32) -> (i32, i32) {
    %c0_i32 = arith.constant 0 : i32
    %c0_i32_0 = arith.constant 0 : i32
    %c0_i32_1 = arith.constant 0 : i32
    return %c0_i32, %c0_i32_0 : i32, i32
  }
  func.func @transform_2(%arg0: i32, %arg1: i32) -> (i32, i32) {
    %c0_i32 = arith.constant 0 : i32
    %c0_i32_0 = arith.constant 0 : i32
    %c0_i32_1 = arith.constant 0 : i32
    return %c0_i32, %c0_i32_0 : i32, i32
  }
  func.func @transform_3(%arg0: i32, %arg1: i32) -> (i32, i32) {
    %c0_i32 = arith.constant 0 : i32
    %c0_i32_0 = arith.constant 0 : i32
    return %arg0, %c0_i32 : i32, i32
  }
}

</mosaic_0001>

<bundles_post_ra>
// kernel: tpu_custom_call.1
= control target key start
LH: loop header
LB: loop body
LE: loop exit
PB: predicated region body
PF: predicated region fallthrough
CT: control target
= control target key end

     0   :  { %8 = vsyncpa [#allocation5], 0  ;;  %s1267_s0 = inlined_call_operand.hbm [shape: f32[2,64,256], index: 0, kind: input, shape index: {}]   ;;  %s1268_s1 = inlined_call_operand.vmem [shape: f32[64,4], index: 1, kind: input, shape index: {}]   ;;  %s1269_s2 = inlined_call_operand.vmem [shape: f32[4,64], index: 2, kind: input, shape index: {}]   ;;  %s1270_s3 = inlined_call_operand.hbm [shape: f32[2,64], index: 3, kind: output, shape index: {}]  }
   0x1   :  { %9 = vsyncpa [#allocation6], 0  ;;  %s1072_s12 = smov [#allocation4]  }
   0x2   :  { %s15_s13 = sshll.u32 %s1072_s12, 4  ;;  %s16_s13 = int_to_ptr.vmem [resolvable:$true] %s15_s13 }
   0x3   :  { %s1036_s14 = scalar_lea.vmem %s16_s13, 4096  ;;  %p1041_p1 = scmp.lt.s32.totalorder %s16_s13, %s16_s13 }
   0x4   :  { %p1037_p0 = scmp.ne.s32.totalorder %s16_s13, %s1036_s14  ;;  %p1042_p2 = scmp.lt.s32.totalorder %s1036_s14, %s1036_s14 }
   0x6   :  { %p1043_p3 = por %p1042_p2, %p1041_p1 }
   0x8   :  { %p1044_p4 = pnand %p1043_p3, %p1037_p0 }
   0xa   :  { %1047 = shalt.err (!%p1044_p4)
}
   0xb   :  { %s1073_s15 = smov 256   ;;  %s1074_s16 = smov 16  }
   0xc   :  { %21 = dma.hbm_to_vmem [thread:$0]  %s1267_s0, 4096, %s16_s13, [#allocation5], %s1073_s15, %s1073_s15, %s1074_s16  }
   0xd   :  { %1068 = dma.done.wait [#allocation5], 4096  }
   0xe   :  { %1069 = vsyncadd [#allocation5], 4294963200  ;;  %v73_v0 = vld [vmem:[#allocation4 + $0x80] sm:$0xff]  ;;  %v185_v1 = vld [vmem:[#allocation4 + $0x88] sm:$0xff]  ;;  %v1075_v60 = vmov 0.0   ;;  %vm1076_vm0 = vmmov 0  }
   0xf   :  { %v65_v2 = vld [vmem:[#allocation4] sm:$0xff]  ;;  %v217_v3 = vadd.f32 %v185_v1, %v73_v0  ;;  %v177_v4 = vld [vmem:[#allocation4 + $0x8] sm:$0xff]  ;;  %v74_v5 = vld [vmem:[#allocation4 + $0x90] sm:$0xff]  ;;  %v265_v27 = vmax.f32 %v73_v0, %v185_v1  ;;  %970 = vmatprep.subr.mxu0 %v1075_v60  ;;  %989 = vmatprep.subr.mxu1 %v1075_v60  ;;  %vm440_vm1 = vcmask 130112   ;;  %vm447_vm2 = vcmask 195712  }
  0x10   :  { %v186_v6 = vld [vmem:[#allocation4 + $0x98] sm:$0xff]  ;;  %v209_v7 = vadd.f32 %v177_v4, %v65_v2  ;;  %v66_v8 = vld [vmem:[#allocation4 + $0x10] sm:$0xff]  ;;  %v75_v12 = vld [vmem:[#allocation4 + $0xa0] sm:$0xff]  ;;  %v257_v25 = vmax.f32 %v65_v2, %v177_v4  ;;  %986 = vmatprep.mubr.msk.f32.mxu0 %vm1076_vm0, %v1075_v60  ;;  %1005 = vmatprep.mubr.msk.f32.mxu1 %vm1076_vm0, %v1075_v60  ;;  %vm454_vm3 = vcmask 261312   ;;  %vm461_vm4 = vcmask 326912  }
  0x11   :  { %v178_v9 = vld [vmem:[#allocation4 + $0x18] sm:$0xff]  ;;  %324 = vadd.xlane.f32.xlu1 %v217_v3  ;;  %v218_v10 = vadd.f32 %v186_v6, %v74_v5  ;;  %v187_v13 = vld [vmem:[#allocation4 + $0xa8] sm:$0xff]  ;;  %v67_v14 = vld [vmem:[#allocation4 + $0x20] sm:$0xff]  ;;  %v266_v26 = vmax.f32 %v74_v5, %v186_v6  ;;  %vm468_vm5 = vcmask 392512   ;;  %vm475_vm6 = vcmask 458112  }
  0x12   :  { %308 = vadd.xlane.f32.xlu0 %v209_v7  ;;  %v210_v11 = vadd.f32 %v178_v9, %v66_v8  ;;  %v179_v15 = vld [vmem:[#allocation4 + $0x28] sm:$0xff]  ;;  %v219_v16 = vadd.f32 %v187_v13, %v75_v12  ;;  %v76_v18 = vld [vmem:[#allocation4 + $0xb0] sm:$0xff]  ;;  %v188_v19 = vld [vmem:[#allocation4 + $0xb8] sm:$0xff]  ;;  %v258_v24 = vmax.f32 %v66_v8, %v178_v9  ;;  %v267_v34 = vmax.f32 %v75_v12, %v187_v13 }
  0x13   :  { %v211_v17 = vadd.f32 %v179_v15, %v67_v14  ;;  %v68_v20 = vld [vmem:[#allocation4 + $0x30] sm:$0xff]  ;;  %v180_v21 = vld [vmem:[#allocation4 + $0x38] sm:$0xff]  ;;  %v220_v22 = vadd.f32 %v188_v19, %v76_v18  ;;  %v77_v28 = vld [vmem:[#allocation4 + $0xc0] sm:$0xff]  ;;  %v259_v35 = vmax.f32 %v67_v14, %v179_v15  ;;  %v268_v42 = vmax.f32 %v76_v18, %v188_v19 }
  0x14   :  { %v212_v23 = vadd.f32 %v180_v21, %v68_v20  ;;  %v189_v29 = vld [vmem:[#allocation4 + $0xc8] sm:$0xff]  ;;  %v69_v30 = vld [vmem:[#allocation4 + $0x40] sm:$0xff]  ;;  %v78_v36 = vld [vmem:[#allocation4 + $0xd0] sm:$0xff]  ;;  %v260_v43 = vmax.f32 %v68_v20, %v180_v21  ;;  %vm482_vm7 = vcmask 523712   ;;  %vm523_vm8 = vcmask 1041409  }
  0x15   :  { %326 = vadd.xlane.f32.xlu1 %v218_v10  ;;  %v181_v31 = vld [vmem:[#allocation4 + $0x48] sm:$0xff]  ;;  %v221_v32 = vadd.f32 %v189_v29, %v77_v28  ;;  %v190_v37 = vld [vmem:[#allocation4 + $0xd8] sm:$0xff]  ;;  %v70_v38 = vld [vmem:[#allocation4 + $0x50] sm:$0xff]  ;;  %v269_v50 = vmax.f32 %v77_v28, %v189_v29  ;;  %vm525_vm9 = vcmask 523264   ;;  %vm771_vm10 = vcmask 1043456  }
  0x16   :  { %310 = vadd.xlane.f32.xlu0 %v210_v11  ;;  %v213_v33 = vadd.f32 %v181_v31, %v69_v30  ;;  %v182_v39 = vld [vmem:[#allocation4 + $0x58] sm:$0xff]  ;;  %v222_v40 = vadd.f32 %v190_v37, %v78_v36  ;;  %v79_v44 = vld [vmem:[#allocation4 + $0xe0] sm:$0xff]  ;;  %v191_v45 = vld [vmem:[#allocation4 + $0xe8] sm:$0xff]  ;;  %v261_v51 = vmax.f32 %v69_v30, %v181_v31  ;;  %v270_v58 = vmax.f32 %v78_v36, %v190_v37 }
  0x17   :  { %v214_v41 = vadd.f32 %v182_v39, %v70_v38  ;;  %v71_v46 = vld [vmem:[#allocation4 + $0x60] sm:$0xff]  ;;  %v183_v47 = vld [vmem:[#allocation4 + $0x68] sm:$0xff]  ;;  %v223_v48 = vadd.f32 %v191_v45, %v79_v44  ;;  %v80_v52 = vld [vmem:[#allocation4 + $0xf0] sm:$0xff]  ;;  %v262_v59 = vmax.f32 %v70_v38, %v182_v39  ;;  %v271_v63 = vmax.f32 %v79_v44, %v191_v45 }
  0x18   :  { %v215_v49 = vadd.f32 %v183_v47, %v71_v46  ;;  %v192_v53 = vld [vmem:[#allocation4 + $0xf8] sm:$0xff]  ;;  %v72_v54 = vld [vmem:[#allocation4 + $0x70] sm:$0xff]  ;;  %v263_v0 = vmax.f32 %v71_v46, %v183_v47  ;;  %v409_v1 = vld [vmem:[%s1268_s1 + $0x28] sm:$0xff]  ;;  %vm767_vm11 = vcmask 31744   ;;  %vm924_vm12 = vcmask 517120  }
  0x19   :  { %328 = vadd.xlane.f32.xlu1 %v219_v16  ;;  %v184_v55 = vld [vmem:[#allocation4 + $0x78] sm:$0xff]  ;;  %v224_v56 = vadd.f32 %v192_v53, %v80_v52  ;;  %v410_v62 = vld [vmem:[%s1268_s1 + $0x30] sm:$0xff]  ;;  %v408_v2 = vld [vmem:[%s1268_s1 + $0x20] sm:$0xff]  ;;  %v272_v3 = vmax.f32 %v80_v52, %v192_v53 }
  0x1a   :  { %312 = vadd.xlane.f32.xlu0 %v211_v17  ;;  %v216_v57 = vadd.f32 %v184_v55, %v72_v54  ;;  %v411_v61 = vld [vmem:[%s1268_s1 + $0x38] sm:$0xff]  ;;  %v264_v4 = vmax.f32 %v72_v54, %v184_v55  ;;  %v406_v6 = vld [vmem:[%s1268_s1 + $0x10] sm:$0xff]  ;;  %v405_v7 = vld [vmem:[%s1268_s1 + $0x8] sm:$0xff] }
  0x1b   :  { %971 = vmatpush3.msra.mxu0 %v411_v61  ;;  %990 = vmatpush3.msra.mxu1 %v411_v61  ;;  %v407_v5 = vld [vmem:[%s1268_s1 + $0x18] sm:$0xff]  ;;  %v404_v8 = vld [vmem:[%s1268_s1] sm:$0xff] }
  0x1c   :  { %972 = vmatprep.subr.mxu0 %v1075_v60  ;;  %991 = vmatprep.subr.mxu1 %v1075_v60 }
  0x1d   :  { %330 = vadd.xlane.f32.xlu1 %v220_v22  ;;  %973 = vmatpush3.msra.mxu0 %v410_v62 }
  0x1e   :  { %314 = vadd.xlane.f32.xlu0 %v212_v23  ;;  %974 = vmatprep.subr.mxu0 %v1075_v60  ;;  %v429_v23 = vlaneseq }
  0x1f   :  { %975 = vmatpush3.msra.mxu0 %v409_v1  ;;  %992 = vmatpush3.msra.mxu1 %v410_v62 }
  0x20   :  { %976 = vmatprep.subr.mxu0 %v1075_v60  ;;  %993 = vmatprep.subr.mxu1 %v1075_v60  ;;  %v432_v28 = vshrl.u32 %v429_v23, 7 }
  0x21   :  { %374 = vmax.xlane.f32.xlu1 %v258_v24  ;;  %977 = vmatpush3.msra.mxu0 %v408_v2 }
  0x22   :  { %372 = vmax.xlane.f32.xlu0 %v257_v25  ;;  %978 = vmatprep.subr.mxu0 %v1075_v60 }
  0x23   :  { %979 = vmatpush3.msra.mxu0 %v407_v5  ;;  %994 = vmatpush3.msra.mxu1 %v409_v1 }
  0x24   :  { %980 = vmatprep.subr.mxu0 %v1075_v60  ;;  %995 = vmatprep.subr.mxu1 %v1075_v60 }
  0x25   :  { %390 = vmax.xlane.f32.xlu1 %v266_v26  ;;  %981 = vmatpush3.msra.mxu0 %v406_v6  ;;  %v430_v26 = vand.u32 127, %v429_v23 }
  0x26   :  { %388 = vmax.xlane.f32.xlu0 %v265_v27  ;;  %982 = vmatprep.subr.mxu0 %v1075_v60 }
  0x27   :  { %983 = vmatpush3.msra.mxu0 %v405_v7  ;;  %996 = vmatpush3.msra.mxu1 %v408_v2  ;;  %v435_v30 = vadd.s32 4294967288, %v430_v26  ;;  %v442_v31 = vadd.s32 4294967280, %v430_v26  ;;  %v463_v36 = vadd.s32 4294967256, %v430_v26 }
  0x28   :  { %984 = vmatprep.subr.mxu0 %v1075_v60  ;;  %997 = vmatprep.subr.mxu1 %v1075_v60 }
  0x29   :  { %332 = vadd.xlane.f32.xlu1 %v221_v32  ;;  %985 = vmatpush3.msra.mxu0 %v404_v8  ;;  %v449_v32 = vadd.s32 4294967272, %v430_v26  ;;  %v1165_v38 = vsub.s32 %v435_v30, %v432_v28  ;;  %v1167_v39 = vsub.s32 %v442_v31, %v432_v28 }
  0x2a   :  { %316 = vadd.xlane.f32.xlu0 %v213_v33  ;;  %998 = vmatpush3.msra.mxu1 %v407_v5  ;;  %v456_v33 = vadd.s32 4294967264, %v430_v26 }
  0x2b   :  { %1008 = vmatprep.subr.mxu0 %v1075_v60  ;;  %999 = vmatprep.subr.mxu1 %v1075_v60 }
  0x2c   :  { %1000 = vmatpush3.msra.mxu1 %v406_v6  ;;  %v1171_v45 = vsub.s32 %v456_v33, %v432_v28 }
  0x2d   :  { %392 = vmax.xlane.f32.xlu1 %v267_v34  ;;  %1001 = vmatprep.subr.mxu1 %v1075_v60 }
  0x2e   :  { %376 = vmax.xlane.f32.xlu0 %v259_v35  ;;  %1002 = vmatpush3.msra.mxu1 %v405_v7  ;;  %v1161_v35 = vsub.s32 %v430_v26, %v432_v28 }
  0x2f   :  { %1003 = vmatprep.subr.mxu1 %v1075_v60 }
  0x30   :  { %1004 = vmatpush3.msra.mxu1 %v404_v8 }
  0x31   :  { %334 = vadd.xlane.f32.xlu1 %v222_v40  ;;  %1013 = vmatprep.subr.mxu1 %v1075_v60  ;;  %v470_v40 = vadd.s32 4294967248, %v430_v26 }
  0x32   :  { %318 = vadd.xlane.f32.xlu0 %v214_v41 }
  0x33   :  { %v1175_v55 = vsub.s32 %v470_v40, %v432_v28 }
  0x35   :  { %394 = vmax.xlane.f32.xlu1 %v268_v42  ;;  %v1169_v42 = vsub.s32 %v449_v32, %v432_v28 }
  0x36   :  { %378 = vmax.xlane.f32.xlu0 %v260_v43 }
  0x39   :  { %336 = vadd.xlane.f32.xlu1 %v223_v48 }
  0x3a   :  { %320 = vadd.xlane.f32.xlu0 %v215_v49 }
  0x3d   :  { %396 = vmax.xlane.f32.xlu1 %v269_v50  ;;  %v1173_v50 = vsub.s32 %v463_v36, %v432_v28 }
  0x3e   :  { %380 = vmax.xlane.f32.xlu0 %v261_v51 }
  0x41   :  { %338 = vadd.xlane.f32.xlu1 %v224_v56 }
  0x42   :  { %322 = vadd.xlane.f32.xlu0 %v216_v57 }
  0x45   :  { %398 = vmax.xlane.f32.xlu1 %v270_v58 }
  0x46   :  { %382 = vmax.xlane.f32.xlu0 %v262_v59  ;;  %v477_v59 = vadd.s32 4294967240, %v430_v26 }
  0x49   :  { %400 = vmax.xlane.f32.xlu1 %v271_v63 }
  0x4a   :  { %384 = vmax.xlane.f32.xlu0 %v263_v0 }
  0x4d   :  { %402 = vmax.xlane.f32.xlu1 %v272_v3 }
  0x4e   :  { %386 = vmax.xlane.f32.xlu0 %v264_v4 }
  0x9a   :  { %v325_v9 = vpop.xlane.xlu1 %324 }
  0x9b   :  { %v309_v10 = vpop.xlane.xlu0 %308  ;;  %v348_v47 = vmul.f32 0.00390625, %v325_v9 }
  0x9c   :  { %v340_v52 = vmul.f32 0.00390625, %v309_v10 }
  0x9d   :  { %v487_v2 = vrot.slane %v348_v47, %v1161_v35 }
  0x9e   :  { %v327_v11 = vpop.xlane.xlu1 %326  ;;  %v434_v7 = vrot.slane %v340_v52, %v1161_v35 }
  0x9f   :  { %v311_v12 = vpop.xlane.xlu0 %310  ;;  %v349_v41 = vmul.f32 0.00390625, %v327_v11 }
  0xa0   :  { %v341_v43 = vmul.f32 0.00390625, %v311_v12 }
  0xa1   :  { %v491_v56 = vrot.slane %v349_v41, %v1165_v38 }
  0xa2   :  { %v329_v13 = vpop.xlane.xlu1 %328  ;;  %v439_v61 = vrot.slane %v341_v43, %v1165_v38 }
  0xa3   :  { %v313_v14 = vpop.xlane.xlu0 %312  ;;  %v350_v44 = vmul.f32 0.00390625, %v329_v13  ;;  %v492_v10 = vsel %vm440_vm1, %v491_v56, %v487_v2  ;;  %v1193_v13 = vsub.s32 %v477_v59, %v432_v28 }
  0xa4   :  { %v342_v48 = vmul.f32 0.00390625, %v313_v14  ;;  %v441_v14 = vsel %vm440_vm1, %v439_v61, %v434_v7 }
  0xa5   :  { %v496_v62 = vrot.slane %v350_v44, %v1167_v39 }
  0xa6   :  { %v331_v15 = vpop.xlane.xlu1 %330  ;;  %v446_v3 = vrot.slane %v342_v48, %v1167_v39 }
  0xa7   :  { %v315_v16 = vpop.xlane.xlu0 %314  ;;  %v351_v49 = vmul.f32 0.00390625, %v331_v15  ;;  %v497_v15 = vsel %vm447_vm2, %v496_v62, %v492_v10 }
  0xa8   :  { %v343_v53 = vmul.f32 0.00390625, %v315_v16  ;;  %v448_v23 = vsel %vm447_vm2, %v446_v3, %v441_v14 }
  0xa9   :  { %v501_v4 = vrot.slane %v351_v49, %v1169_v42 }
  0xaa   :  { %v1147_v17 = vpop.xlane.xlu1 %374  ;;  %v453_v8 = vrot.slane %v343_v53, %v1169_v42 }
  0xab   :  { %v1149_v18 = vpop.xlane.xlu0 %372  ;;  %v502_v26 = vsel %vm454_vm3, %v501_v4, %v497_v15  ;;  %v622_v53 = vrot.slane %v1147_v17, %v1165_v38 }
  0xac   :  { %v455_v28 = vsel %vm454_vm3, %v453_v8, %v448_v23 }
  0xae   :  { %v1151_v19 = vpop.xlane.xlu1 %390 }
  0xaf   :  { %v1153_v20 = vpop.xlane.xlu0 %388  ;;  %v661_v47 = vrot.slane %v1151_v19, %v1165_v38 }
  0xb0   :  { %v657_v48 = vrot.slane %v1153_v20, %v1161_v35 }
  0xb2   :  { %v333_v21 = vpop.xlane.xlu1 %332 }
  0xb3   :  { %v317_v22 = vpop.xlane.xlu0 %316  ;;  %v352_v54 = vmul.f32 0.00390625, %v333_v21 }
  0xb4   :  { %v344_v57 = vmul.f32 0.00390625, %v317_v22 }
  0xb5   :  { %v506_v9 = vrot.slane %v352_v54, %v1171_v45  ;;  %v618_v54 = vrot.slane %v1149_v18, %v1161_v35 }
  0xb6   :  { %v1155_v24 = vpop.xlane.xlu1 %392  ;;  %v460_v11 = vrot.slane %v344_v57, %v1171_v45 }
  0xb7   :  { %v1157_v25 = vpop.xlane.xlu0 %376  ;;  %v507_v31 = vsel %vm461_vm4, %v506_v9, %v502_v26  ;;  %v666_v56 = vrot.slane %v1155_v24, %v1167_v39  ;;  %v662_v24 = vsel %vm440_vm1, %v661_v47, %v657_v48 }
  0xb8   :  { %v462_v33 = vsel %vm461_vm4, %v460_v11, %v455_v28  ;;  %v627_v19 = vrot.slane %v1157_v25, %v1167_v39  ;;  %v412_v11 = vld [vmem:[%s1269_s2] sm:$0xf]  ;;  %s1077_s2 = smov [#allocation7]  }
  0xb9   :  { %s932_s8 = sshll.u32 %s1077_s2, 4  ;;  %s933_s8 = int_to_ptr.vmem [resolvable:$true] %s932_s8 }
  0xba   :  { %v335_v27 = vpop.xlane.xlu1 %334  ;;  %s1048_s9 = scalar_lea.vmem %s933_s8, 32  ;;  %p1053_p6 = scmp.lt.s32.totalorder %s933_s8, %s933_s8 }
  0xbb   :  { %v319_v29 = vpop.xlane.xlu0 %318  ;;  %v353_v58 = vmul.f32 0.00390625, %v335_v27  ;;  %p1049_p5 = scmp.ne.s32.totalorder %s933_s8, %s1048_s9  ;;  %p1054_p7 = scmp.lt.s32.totalorder %s1048_s9, %s1048_s9 }
  0xbc   :  { %v345_v63 = vmul.f32 0.00390625, %v319_v29 }
  0xbd   :  { %v511_v12 = vrot.slane %v353_v58, %v1173_v50  ;;  %p1055_p8 = por %p1054_p7, %p1053_p6 }
  0xbe   :  { %v1159_v34 = vpop.xlane.xlu1 %394  ;;  %v467_v16 = vrot.slane %v345_v63, %v1173_v50 }
  0xbf   :  { %v1163_v37 = vpop.xlane.xlu0 %378  ;;  %v512_v36 = vsel %vm468_vm5, %v511_v12, %v507_v31  ;;  %v671_v20 = vrot.slane %v1159_v34, %v1169_v42  ;;  %v623_v34 = vsel %vm440_vm1, %v622_v53, %v618_v54  ;;  %p1056_p9 = pnand %p1055_p8, %p1049_p5 }
  0xc0   :  { %v469_v41 = vsel %vm468_vm5, %v467_v16, %v462_v33  ;;  %v632_v59 = vrot.slane %v1163_v37, %v1169_v42  ;;  %v667_v37 = vsel %vm447_vm2, %v666_v56, %v662_v24  ;;  %v628_v61 = vsel %vm447_vm2, %v627_v19, %v623_v34 }
  0xc1   :  { %v672_v62 = vsel %vm454_vm3, %v671_v20, %v667_v37 }
  0xc2   :  { %v337_v46 = vpop.xlane.xlu1 %336  ;;  %v633_v63 = vsel %vm454_vm3, %v632_v59, %v628_v61 }
  0xc3   :  { %v321_v51 = vpop.xlane.xlu0 %320  ;;  %v354_v0 = vmul.f32 0.00390625, %v337_v46 }
  0xc4   :  { %v346_v5 = vmul.f32 0.00390625, %v321_v51 }
  0xc5   :  { %v516_v21 = vrot.slane %v354_v0, %v1175_v55 }
  0xc6   :  { %v1180_v1 = vpop.xlane.xlu1 %396  ;;  %v474_v27 = vrot.slane %v346_v5, %v1175_v55 }
  0xc7   :  { %v1185_v6 = vpop.xlane.xlu0 %380  ;;  %v517_v43 = vsel %vm475_vm6, %v516_v21, %v512_v36  ;;  %v676_v17 = vrot.slane %v1180_v1, %v1171_v45 }
  0xc8   :  { %v476_v49 = vsel %vm475_vm6, %v474_v27, %v469_v41  ;;  %v637_v35 = vrot.slane %v1185_v6, %v1171_v45 }
  0xc9   :  { %v677_v0 = vsel %vm461_vm4, %v676_v17, %v672_v62 }
  0xca   :  { %v339_v22 = vpop.xlane.xlu1 %338  ;;  %v638_v2 = vsel %vm461_vm4, %v637_v35, %v633_v63 }
  0xcb   :  { %v355_v29 = vmul.f32 0.00390625, %v339_v22  ;;  %v323_v30 = vpop.xlane.xlu0 %322 }
  0xcc   :  { %v347_v32 = vmul.f32 0.00390625, %v323_v30 }
  0xcd   :  { %v521_v40 = vrot.slane %v355_v29, %v1193_v13 }
  0xce   :  { %v481_v44 = vrot.slane %v347_v32, %v1193_v13  ;;  %v399_v46 = vpop.xlane.xlu1 %398 }
  0xcf   :  { %v383_v51 = vpop.xlane.xlu0 %382  ;;  %v522_v52 = vsel %vm482_vm7, %v521_v40, %v517_v43  ;;  %v681_v25 = vrot.slane %v399_v46, %v1173_v50 }
  0xd0   :  { %v483_v57 = vsel %vm482_vm7, %v481_v44, %v476_v49  ;;  %v642_v39 = vrot.slane %v383_v51, %v1173_v50 }
  0xd1   :  { %v524_v58 = vsel %vm523_vm8, %v522_v52, %v483_v57  ;;  %v682_v3 = vsel %vm468_vm5, %v681_v25, %v677_v0 }
  0xd2   :  { %987 = vmatmul.mubr.msk.f32.vlgmr.msra.gmra.mxu0 %vm525_vm9, %v524_v58  ;;  %v401_v18 = vpop.xlane.xlu1 %400  ;;  %v643_v5 = vsel %vm468_vm5, %v642_v39, %v638_v2 }
  0xd3   :  { %v385_v38 = vpop.xlane.xlu0 %384  ;;  %1010 = vmatprep.mubr.msk.f32.mxu0 %vm1076_vm0, %v1075_v60  ;;  %v686_v42 = vrot.slane %v401_v18, %v1175_v55  ;;  %1009 = vmatpush3.msk.msra.mxu0 %vm771_vm10, %v412_v11 }
  0xd4   :  { %v647_v45 = vrot.slane %v385_v38, %v1175_v55 }
  0xd5   :  { %v687_v6 = vsel %vm475_vm6, %v686_v42, %v682_v3 }
  0xd6   :  { %v403_v1 = vpop.xlane.xlu1 %402  ;;  %v648_v55 = vsel %vm475_vm6, %v647_v45, %v643_v5 }
  0xd7   :  { %v691_v4 = vrot.slane %v403_v1, %v1193_v13  ;;  %v387_v50 = vpop.xlane.xlu0 %386 }
  0xd8   :  { %v652_v7 = vrot.slane %v387_v50, %v1193_v13 }
  0xd9   :  { %v692_v8 = vsel %vm482_vm7, %v691_v4, %v687_v6 }
  0xda   :  { %v653_v9 = vsel %vm482_vm7, %v652_v7, %v648_v55 }
  0xdb   :  { %v693_v10 = vsel %vm523_vm8, %v692_v8, %v653_v9 }
  0xdc   :  { %1006 = vmatmul.mubr.msk.f32.vlgmr.msra.gmra.mxu1 %vm525_vm9, %v693_v10 }
  0xdd   :  { %1015 = vmatprep.mubr.msk.f32.mxu1 %vm1076_vm0, %v1075_v60  ;;  %1014 = vmatpush3.msk.msra.mxu1 %vm771_vm10, %v412_v11 }
 0x192   :  { %v594_v12 = vpop.f32.mrf.mxu0 }
 0x193   :  { %v598_v13 = vmax.f32 %v594_v12, 0.0 }
 0x194   :  { %v988_v14 = vpop.f32.mrf.mxu0 }
 0x195   :  { %1016 = vmatmul.mubr.msk.f32.vlgmr.msra.gmra.mxu1 %vm767_vm11, %v598_v13 }
 0x19c   :  { %v762_v15 = vpop.f32.mrf.mxu1 }
 0x19d   :  { %v766_v16 = vmax.f32 %v762_v15, 0.0 }
 0x19e   :  { %v1007_v21 = vpop.f32.mrf.mxu1 }
 0x19f   :  { %1011 = vmatmul.mubr.msk.f32.vlgmr.msra.gmra.mxu0 %vm767_vm11, %v766_v16 }
 0x255   :  { %v914_v22 = vpop.f32.mrf.mxu1 }
 0x257   :  { %v1017_v23 = vpop.f32.mrf.mxu1 }
 0x25f   :  { %v841_v26 = vpop.f32.mrf.mxu0 }
 0x260   :  { %v915_v60 = vadd.f32 %v914_v22, %v841_v26 }
 0x261   :  { %v1012_v27 = vpop.f32.mrf.mxu0 }
 0x262   :  { %v947_v29 = vmul.f32 -1.442695, %v915_v60 }
 0x264   :  { %1024 = vpow2.f32 %v947_v29 }
 0x271   :  { %v1025_v30 = vpop.eup %1024 }
 0x272   :  { %v921_v28 = vadd.f32 1.0, %v1025_v30 }
 0x274   :  { %1026 = vrcp.f32 %v921_v28 }
 0x281   :  { %v1027_v31 = vpop.eup %1026 }
 0x282   :  { %925 = vst.msk [vmem:[#allocation7] sm:$0x3] %vm924_vm12, %v1027_v31 }
 0x283   :  { %1059 = shalt.err (!%p1056_p9)
}
 0x284   :  { %935 = dma.vmem_to_hbm [thread:$0]  %s933_s8, 32, %s1270_s3, [#allocation6]  }
 0x285   :  { %1070 = dma.done.wait [#allocation6], 32  }
 0x286   :  { %1071 = vsyncadd [#allocation6], 4294967264 }
 0x287   :  { %939 = vsyncpa [#allocation5], 1 }
 0x288   :  { %940 = vsyncpa [#allocation6], 1 }

</bundles_post_ra>
